<compile_context>
chip_gen: v6e
topology: v6e:2x2x1
jax: 0.10.0
libtpu: 0.0.40
codegen_flags: <defaults>
</compile_context>

<pallas_src>
import functools

import jax
import jax.numpy as jnp
from jax.experimental import pallas as pl
from jax.experimental.pallas import tpu as pltpu


def _round_up(n, m):
    return ((n + m - 1) // m) * m


def _gen_defaults():
    """Generation-aware VMEM budget and tile targets (evaluated once at trace time)."""
    try:
        cap = getattr(pltpu.get_tpu_info(), "vmem_capacity_bytes", 128 * 1024 * 1024)
    except Exception:
        cap = 128 * 1024 * 1024
    if cap <= 64 * 1024 * 1024:
        # v7x: 64 MiB per TC -> keep headroom for Mosaic internal scratch/semaphores.
        return 48 * 1024 * 1024, 256, 512
    # v5e / v6e: 128 MiB per TC -> larger tiles amortize per-grid-step overhead.
    return 96 * 1024 * 1024, 512, 1024


def _tile_footprint(tm, tk, dmp, out_isize):
    """Worst-case VMEM bytes for one grid step (double-buffered pipelined operands)."""
    xb = 2 * tm * dmp * 2            # bf16 x row tile
    w1b = 2 * dmp * tk * 2           # bf16 W1 column slab
    w2b = 2 * tk * dmp * 2           # bf16 W2 row slab
    bb = 2 * (tk + dmp) * 4          # f32 bias slabs
    ob = 2 * tm * dmp * out_isize    # output row tile
    acc = tm * dmp * 4               # f32 accumulator scratch
    hid = tm * tk * (4 + 2)          # f32 hidden temp + bf16 copy
    return xb + w1b + w2b + bb + ob + acc + hid


def _choose_tiles(M, dmp, dfp, out_isize, budget, tm_target, tk_target):
    """Pick (tm, tk) multiples of (16, 128) with tk | dfp fitting the VMEM budget."""
    tk_cands = [t for t in range(dfp, 0, -128)
                if dfp % t == 0 and t <= max(tk_target, 128)]
    if not tk_cands:
        tk_cands = [dfp]
    tm = max(16, min(_round_up(tm_target, 16), _round_up(M, 16)))
    while True:
        for tk in tk_cands:
            if _tile_footprint(tm, tk, dmp, out_isize) <= budget:
                return tm, tk
        if tm <= 16:
            return tm, tk_cands[-1]
        tm = max(16, _round_up(tm // 2, 16))


def ffn_kernel(x_ref, w1_ref, b1_ref, w2_ref, b2_ref, o_ref, acc_ref):
    k = pl.program_id(1)

    @pl.when(k == 0)
    def _():
        acc_ref[...] = jnp.zeros_like(acc_ref)

    # Linear 1 over this d_ff slab: (tm, dmp) bf16 @ (dmp, tk) bf16 -> f32, +b1, ReLU.
    h = jnp.dot(x_ref[...], w1_ref[...], preferred_element_type=jnp.float32)
    h = jnp.maximum(h + b1_ref[...], 0.0)
    # Dropout: eval mode -> identity (p=0.1 only active in training).
    # Linear 2 partial product: accumulate (tm, tk) @ (tk, dmp) into the f32 scratch.
    acc_ref[...] += jnp.dot(h.astype(w2_ref.dtype), w2_ref[...],
                            preferred_element_type=jnp.float32)

    @pl.when(k == pl.num_programs(1) - 1)
    def _():
        o_ref[...] = (acc_ref[...] + b2_ref[...]).astype(o_ref.dtype)


def prepare_ffn_params(w1, b1, w2, b2, *, compute_dtype=jnp.bfloat16):
    """Pad (lane-dense multiples of 128) and cast parameters ONCE, not per call.

    Weights are stored pre-transposed as (in, out) so the kernel computes x @ W.
    Zero padding is exact: padded d_ff columns give relu(0+0)=0 and padded W2 rows are
    zero, so they contribute nothing to the valid output region.
    """
    d_model, d_ff = w1.shape
    assert b1.shape == (d_ff,) and w2.shape == (d_ff, d_model) and b2.shape == (d_model,)
    dmp, dfp = _round_up(d_model, 128), _round_up(d_ff, 128)
    w1_p = jnp.zeros((dmp, dfp), compute_dtype).at[:d_model, :d_ff].set(
        w1.astype(compute_dtype))
    b1_p = jnp.zeros((1, dfp), jnp.float32).at[0, :d_ff].set(b1.astype(jnp.float32))
    w2_p = jnp.zeros((dfp, dmp), compute_dtype).at[:d_ff, :d_model].set(
        w2.astype(compute_dtype))
    b2_p = jnp.zeros((1, dmp), jnp.float32).at[0, :d_model].set(b2.astype(jnp.float32))
    return w1_p, b1_p, w2_p, b2_p


@functools.partial(jax.jit, static_argnames=("out_dtype",))
def positionwise_ffn(x, w1_p, b1_p, w2_p, b2_p, *, out_dtype=None):
    """x: (M, d_model) unpadded; w*_p / b*_p come from prepare_ffn_params()."""
    M, d_model = x.shape
    dmp, dfp = w1_p.shape
    assert w2_p.shape == (dfp, dmp)
    compute_dtype = w1_p.dtype
    out_dtype = x.dtype if out_dtype is None else out_dtype
    out_isize = jnp.dtype(out_dtype).itemsize

    budget, tm_target, tk_target = _gen_defaults()
    tm, tk = _choose_tiles(M, dmp, dfp, out_isize, budget, tm_target, tk_target)
    Mp = _round_up(M, tm)
    grid = (Mp // tm, dfp // tk)

    est = _tile_footprint(tm, tk, dmp, out_isize)
    vmem_limit = int(min(budget, max(2 * est, 16 * 1024 * 1024)))

    # Only the activation tile is padded per call (row/lane padding of x itself).
    x_p = jnp.zeros((Mp, dmp), compute_dtype).at[:M, :d_model].set(
        x.astype(compute_dtype))

    out_p = pl.pallas_call(
        ffn_kernel,
        out_shape=jax.ShapeDtypeStruct((Mp, dmp), out_dtype),
        grid_spec=pltpu.PrefetchScalarGridSpec(
            num_scalar_prefetch=0,
            grid=grid,
            in_specs=[
                pl.BlockSpec((tm, dmp), lambda i, k: (i, 0)),   # x row tile (full d_model)
                pl.BlockSpec((dmp, tk), lambda i, k: (0, k)),   # W1 column slab
                pl.BlockSpec((1, tk), lambda i, k: (0, k)),     # b1 slab
                pl.BlockSpec((tk, dmp), lambda i, k: (k, 0)),   # W2 row slab
                pl.BlockSpec((1, dmp), lambda i, k: (0, 0)),    # b2 (grid-invariant)
            ],
            out_specs=pl.BlockSpec((tm, dmp), lambda i, k: (i, 0)),
            scratch_shapes=[pltpu.VMEM((tm, dmp), jnp.float32)],
        ),
        compiler_params=pltpu.CompilerParams(
            dimension_semantics=("parallel", "arbitrary"),   # rows shard across TCs (v7x)
            vmem_limit_bytes=vmem_limit,
        ),
    )(x_p, w1_p, b1_p, w2_p, b2_p)

    return out_p[:M, :d_model]


if __name__ == "__main__":
    # Small shapes implied by the module: (batch, seq, d_model) -> flatten rows.
    batch, seq, d_model, d_ff = 2, 8, 32, 64

    key = jax.random.PRNGKey(0)
    kx, kw1, kb1, kw2, kb2 = jax.random.split(key, 5)

    x = jax.random.normal(kx, (batch, seq, d_model), dtype=jnp.float32)

    # Deterministic synthetic parameter init (nn.Linear-like uniform bounds),
    # stored as (in, out) so the kernel does x @ W.
    bound1 = 1.0 / (d_model ** 0.5)
    bound2 = 1.0 / (d_ff ** 0.5)
    w1 = jax.random.uniform(kw1, (d_model, d_ff), jnp.float32, -bound1, bound1)
    b1 = jax.random.uniform(kb1, (d_ff,), jnp.float32, -bound1, bound1)
    w2 = jax.random.uniform(kw2, (d_ff, d_model), jnp.float32, -bound2, bound2)
    b2 = jax.random.uniform(kb2, (d_model,), jnp.float32, -bound2, bound2)

    # Pad/cast parameters once (parameter-prep time), reuse for every forward call.
    params = prepare_ffn_params(w1, b1, w2, b2)

    x2d = x.reshape(batch * seq, d_model)
    out = positionwise_ffn(x2d, *params)
    out = jax.block_until_ready(out).reshape(batch, seq, d_model)

    # Reference 1: same bf16-operand / f32-accumulate recipe as the kernel (tight check).
    xb, w1b, w2b = (a.astype(jnp.bfloat16) for a in (x2d, w1, w2))
    hb = jnp.maximum(jnp.dot(xb, w1b, preferred_element_type=jnp.float32) + b1, 0.0)
    ref_bf = (jnp.dot(hb.astype(jnp.bfloat16), w2b,
                      preferred_element_type=jnp.float32) + b2)
    ref_bf = ref_bf.reshape(batch, seq, d_model)
    assert jnp.allclose(out, ref_bf, atol=2e-3, rtol=2e-3), "mismatch vs bf16-matched reference"

    # Reference 2: full-f32 math (loose tolerance due to bf16 operands in the kernel).
    ref_f32 = (jnp.maximum(x2d @ w1 + b1, 0.0) @ w2 + b2).reshape(batch, seq, d_model)
    assert jnp.allclose(out, ref_f32, atol=2e-1, rtol=2e-1), "mismatch vs f32 reference"

    print("KERNEL_OK")
</pallas_src>

<mosaic_0001>
module attributes {stable_mosaic.version = 11 : i64} {
  func.func @ffn_kernel(%arg0: i32, %arg1: i32, %arg2: memref<16x128xbf16, #tpu.memory_space<vmem>>, %arg3: memref<128x128xbf16, #tpu.memory_space<vmem>>, %arg4: memref<1x128xf32, #tpu.memory_space<vmem>>, %arg5: memref<128x128xbf16, #tpu.memory_space<vmem>>, %arg6: memref<1x128xf32, #tpu.memory_space<vmem>>, %arg7: memref<16x128xf32, #tpu.memory_space<vmem>>, %arg8: memref<16x128xf32, #tpu.memory_space<vmem>>) attributes {dimension_semantics = [#tpu.dimension_semantics<parallel>, #tpu.dimension_semantics<arbitrary>], iteration_bounds = array<i64: 1, 1>, scalar_prefetch = 0 : i64, scratch_operands = 1 : i64, tpu.core_type = #tpu.core_type<tc>, window_params = [{transform_indices = @transform_0, window_bounds = array<i64: 16, 128>}, {transform_indices = @transform_1, window_bounds = array<i64: 128, 128>}, {transform_indices = @transform_2, window_bounds = array<i64: 1, 128>}, {transform_indices = @transform_3, window_bounds = array<i64: 128, 128>}, {pipeline_mode = #tpu.pipeline_mode<synchronous>, transform_indices = @transform_4, window_bounds = array<i64: 1, 128>}, {transform_indices = @transform_5, window_bounds = array<i64: 16, 128>}]} {
    %c0_i32 = arith.constant 0 : i32
    %0 = arith.cmpi eq, %arg1, %c0_i32 : i32
    %1 = arith.extui %0 : i1 to i32
    %c0_i32_0 = arith.constant 0 : i32
    %2 = arith.cmpi ne, %1, %c0_i32_0 : i32
    scf.if %2 {
      %cst_16 = arith.constant 0.000000e+00 : f32
      %20 = vector.broadcast %cst_16 : f32 to vector<16x128xf32>
      %c0_17 = arith.constant 0 : index
      %c0_18 = arith.constant 0 : index
      %21 = vector.load %arg8[%c0_17, %c0_18] : memref<16x128xf32, #tpu.memory_space<vmem>>, vector<16x128xf32>
      tpu.vector_store %arg8[%c0_17, %c0_18], %20 {strides = array<i32>} : memref<16x128xf32, #tpu.memory_space<vmem>>, vector<16x128xf32>,
    } else {
    }
    %c0 = arith.constant 0 : index
    %c0_1 = arith.constant 0 : index
    %3 = vector.load %arg2[%c0, %c0_1] : memref<16x128xbf16, #tpu.memory_space<vmem>>, vector<16x128xbf16>
    %c0_2 = arith.constant 0 : index
    %c0_3 = arith.constant 0 : index
    %4 = vector.load %arg3[%c0_2, %c0_3] : memref<128x128xbf16, #tpu.memory_space<vmem>>, vector<128x128xbf16>
    %cst = arith.constant dense<0.000000e+00> : vector<16x128xf32>
    %5 = tpu.matmul %3, %4, %cst {dimension_numbers = #tpu.dot_dimension_numbers<[1], [0], [0], [1], [0, 0, 1, 1], [], []>} : vector<16x128xbf16>, vector<128x128xbf16>, vector<16x128xf32> -> vector<16x128xf32>
    %c0_4 = arith.constant 0 : index
    %c0_5 = arith.constant 0 : index
    %6 = vector.load %arg4[%c0_4, %c0_5] : memref<1x128xf32, #tpu.memory_space<vmem>>, vector<1x128xf32>
    %7 = vector.broadcast %6 : vector<1x128xf32> to vector<16x128xf32>
    %8 = arith.addf %5, %7 : vector<16x128xf32>
    %cst_6 = arith.constant 0.000000e+00 : f32
    %9 = vector.broadcast %cst_6 : f32 to vector<16x128xf32>
    %10 = arith.maximumf %8, %9 : vector<16x128xf32>
    %c0_7 = arith.constant 0 : index
    %c0_8 = arith.constant 0 : index
    %11 = vector.load %arg8[%c0_7, %c0_8] : memref<16x128xf32, #tpu.memory_space<vmem>>, vector<16x128xf32>
    %12 = arith.truncf %10 : vector<16x128xf32> to vector<16x128xbf16>
    %c0_9 = arith.constant 0 : index
    %c0_10 = arith.constant 0 : index
    %13 = vector.load %arg5[%c0_9, %c0_10] : memref<128x128xbf16, #tpu.memory_space<vmem>>, vector<128x128xbf16>
    %cst_11 = arith.constant dense<0.000000e+00> : vector<16x128xf32>
    %14 = tpu.matmul %12, %13, %cst_11 {dimension_numbers = #tpu.dot_dimension_numbers<[1], [0], [0], [1], [0, 0, 1, 1], [], []>} : vector<16x128xbf16>, vector<128x128xbf16>, vector<16x128xf32> -> vector<16x128xf32>
    %15 = arith.addf %11, %14 : vector<16x128xf32>
    %c0_12 = arith.constant 0 : index
    %c0_13 = arith.constant 0 : index
    %16 = vector.load %arg8[%c0_12, %c0_13] : memref<16x128xf32, #tpu.memory_space<vmem>>, vector<16x128xf32>
    tpu.vector_store %arg8[%c0_12, %c0_13], %15 {strides = array<i32>} : memref<16x128xf32, #tpu.memory_space<vmem>>, vector<16x128xf32>,
    %c0_i32_14 = arith.constant 0 : i32
    %17 = arith.cmpi eq, %arg1, %c0_i32_14 : i32
    %18 = arith.extui %17 : i1 to i32
    %c0_i32_15 = arith.constant 0 : i32
    %19 = arith.cmpi ne, %18, %c0_i32_15 : i32
    scf.if %19 {
      %c0_16 = arith.constant 0 : index
      %c0_17 = arith.constant 0 : index
      %20 = vector.load %arg8[%c0_16, %c0_17] : memref<16x128xf32, #tpu.memory_space<vmem>>, vector<16x128xf32>
      %c0_18 = arith.constant 0 : index
      %c0_19 = arith.constant 0 : index
      %21 = vector.load %arg6[%c0_18, %c0_19] : memref<1x128xf32, #tpu.memory_space<vmem>>, vector<1x128xf32>
      %22 = vector.broadcast %21 : vector<1x128xf32> to vector<16x128xf32>
      %23 = arith.addf %20, %22 : vector<16x128xf32>
      %c0_20 = arith.constant 0 : index
      %c0_21 = arith.constant 0 : index
      %24 = vector.load %arg7[%c0_20, %c0_21] : memref<16x128xf32, #tpu.memory_space<vmem>>, vector<16x128xf32>
      tpu.vector_store %arg7[%c0_20, %c0_21], %23 {strides = array<i32>} : memref<16x128xf32, #tpu.memory_space<vmem>>, vector<16x128xf32>,
    } else {
    }
    return
  }
  func.func @transform_0(%arg0: i32, %arg1: i32) -> (i32, i32) {
    %c0_i32 = arith.constant 0 : i32
    %c0_i32_0 = arith.constant 0 : i32
    return %arg0, %c0_i32 : i32, i32
  }
  func.func @transform_1(%arg0: i32, %arg1: i32) -> (i32, i32) {
    %c0_i32 = arith.constant 0 : i32
    %c0_i32_0 = arith.constant 0 : i32
    return %c0_i32, %arg1 : i32, i32
  }
  func.func @transform_2(%arg0: i32, %arg1: i32) -> (i32, i32) {
    %c0_i32 = arith.constant 0 : i32
    %c0_i32_0 = arith.constant 0 : i32
    return %c0_i32, %arg1 : i32, i32
  }
  func.func @transform_3(%arg0: i32, %arg1: i32) -> (i32, i32) {
    %c0_i32 = arith.constant 0 : i32
    %c0_i32_0 = arith.constant 0 : i32
    return %arg1, %c0_i32 : i32, i32
  }
  func.func @transform_4(%arg0: i32, %arg1: i32) -> (i32, i32) {
    %c0_i32 = arith.constant 0 : i32
    %c0_i32_0 = arith.constant 0 : i32
    %c0_i32_1 = arith.constant 0 : i32
    return %c0_i32, %c0_i32_0 : i32, i32
  }
  func.func @transform_5(%arg0: i32, %arg1: i32) -> (i32, i32) {
    %c0_i32 = arith.constant 0 : i32
    %c0_i32_0 = arith.constant 0 : i32
    return %arg0, %c0_i32 : i32, i32
  }
}

</mosaic_0001>

<bundles_post_ra>
// kernel: positionwise_ffn.1
= control target key start
LH: loop header
LB: loop body
LE: loop exit
PB: predicated region body
PF: predicated region fallthrough
CT: control target
= control target key end

     0   :  { %10 = vsyncpa [#allocation4], 0  ;;  %s550_s0 = inlined_call_operand.vmem [shape: bf16[16,128], index: 0, kind: input, shape index: {}]   ;;  %s551_s1 = inlined_call_operand.hbm [shape: bf16[128,128], index: 1, kind: input, shape index: {}]   ;;  %s552_s2 = inlined_call_operand.vmem [shape: f32[1,128], index: 2, kind: input, shape index: {}]   ;;  %s553_s3 = inlined_call_operand.hbm [shape: bf16[128,128], index: 3, kind: input, shape index: {}]   ;;  %s554_s4 = inlined_call_operand.vmem [shape: f32[1,128], index: 4, kind: input, shape index: {}]   ;;  %s555_s5 = inlined_call_operand.hbm [shape: f32[16,128], index: 5, kind: output, shape index: {}]  }
   0x1   :  { %11 = vsyncpa [#allocation7], 0 }
   0x2   :  { %12 = vsyncpa [#allocation5], 0  ;;  %s493_s18 = smov [#allocation3]  }
   0x3   :  { %s20_s19 = sshll.u32 %s493_s18, 4  ;;  %s21_s19 = int_to_ptr.vmem [resolvable:$true] %s20_s19 }
   0x4   :  { %s435_s20 = scalar_lea.vmem %s21_s19, 1024  ;;  %p440_p1 = scmp.lt.s32.totalorder %s21_s19, %s21_s19 }
   0x5   :  { %p436_p0 = scmp.ne.s32.totalorder %s21_s19, %s435_s20  ;;  %p441_p2 = scmp.lt.s32.totalorder %s435_s20, %s435_s20 }
   0x7   :  { %p442_p3 = por %p441_p2, %p440_p1 }
   0x9   :  { %p443_p4 = pnand %p442_p3, %p436_p0 }
   0xb   :  { %446 = shalt.err (!%p443_p4)
}
   0xc   :  { %s494_s21 = smov 64   ;;  %s495_s22 = smov 4  }
   0xd   :  { %26 = dma.hbm_to_vmem [thread:$0]  %s551_s1, 1024, %s21_s19, [#allocation4], %s494_s21, %s494_s21, %s495_s22  }
   0xe   :  { %s496_s25 = smov [#allocation6]  }
   0xf   :  { %s34_s26 = sshll.u32 %s496_s25, 4  ;;  %s35_s26 = int_to_ptr.vmem [resolvable:$true] %s34_s26 }
  0x10   :  { %s455_s27 = scalar_lea.vmem %s35_s26, 1024  ;;  %p460_p6 = scmp.lt.s32.totalorder %s35_s26, %s35_s26 }
  0x11   :  { %p456_p5 = scmp.ne.s32.totalorder %s35_s26, %s455_s27  ;;  %p461_p7 = scmp.lt.s32.totalorder %s455_s27, %s455_s27 }
  0x13   :  { %p462_p8 = por %p461_p7, %p460_p6 }
  0x15   :  { %p463_p9 = pnand %p462_p8, %p456_p5 }
  0x17   :  { %466 = shalt.err (!%p463_p9)
}
  0x18   :  { %40 = dma.hbm_to_vmem [thread:$0]  %s553_s3, 1024, %s35_s26, [#allocation7], %s494_s21, %s494_s21, %s495_s22  }
  0x19   :  { %487 = dma.done.wait [#allocation4], 1024  }
  0x1a   :  { %488 = vsyncadd [#allocation4], 4294966272 }
  0x1b   :  { %489 = dma.done.wait [#allocation7], 1024  }
  0x1c   :  { %490 = vsyncadd [#allocation7], 4294966272  ;;  %v497_v0 = vmov 0.0   ;;  %vm498_vm0 = vmmov 0   ;;  %v410_v1 = vld [vmem:[#allocation3 + $0x38] sm:$0xff]   ;;  %v411_v2 = vld [vmem:[#allocation3 + $0x30] sm:$0xff]  }
  0x1d   :  { %361 = vmatprep.subr.bf16.mxu0 %v497_v0  ;;  %377 = vmatprep.mubr.msk.bf16.mxu0 %vm498_vm0, %v497_v0  ;;  %v412_v3 = vld [vmem:[#allocation3 + $0x28] sm:$0xff]   ;;  %v419_v4 = vld [vmem:[#allocation6 + $0x38] sm:$0xff]   ;;  %v413_v5 = vld [vmem:[#allocation3 + $0x20] sm:$0xff]   ;;  %s499_s8 = smov [#allocation8]  }
  0x1e   :  { %381 = vmatprep.subr.bf16.mxu1 %v497_v0  ;;  %397 = vmatprep.mubr.msk.bf16.mxu1 %vm498_vm0, %v497_v0  ;;  %v420_v6 = vld [vmem:[#allocation6 + $0x30] sm:$0xff]   ;;  %v414_v7 = vld [vmem:[#allocation3 + $0x18] sm:$0xff]   ;;  %v421_v8 = vld [vmem:[#allocation6 + $0x28] sm:$0xff]   ;;  %s311_s9 = sshll.u32 %s499_s8, 4  ;;  %s312_s9 = int_to_ptr.vmem [resolvable:$true] %s311_s9 }
  0x1f   :  { %362 = vmatpush3.bf16.msra.mxu0 %v410_v1  ;;  %382 = vmatpush3.bf16.msra.mxu1 %v419_v4  ;;  %v415_v9 = vld [vmem:[#allocation3 + $0x10] sm:$0xff]   ;;  %v422_v10 = vld [vmem:[#allocation6 + $0x20] sm:$0xff]   ;;  %v416_v11 = vld [vmem:[#allocation3 + $0x8] sm:$0xff]   ;;  %p472_p11 = scmp.lt.s32.totalorder %s312_s9, %s312_s9 }
  0x20   :  { %363 = vmatprep.subr.bf16.mxu0 %v497_v0  ;;  %383 = vmatprep.subr.bf16.mxu1 %v497_v0  ;;  %v423_v12 = vld [vmem:[#allocation6 + $0x18] sm:$0xff]   ;;  %v417_v13 = vld [vmem:[#allocation3] sm:$0xff]   ;;  %v424_v15 = vld [vmem:[#allocation6 + $0x10] sm:$0xff]  }
  0x21   :  { %v418_v14 = vld [vmem:[%s550_s0] sm:$0xff]   ;;  %v425_v16 = vld [vmem:[#allocation6 + $0x8] sm:$0xff]  }
  0x22   :  { %v426_v17 = vld [vmem:[#allocation6] sm:$0xff]  }
  0x23   :  { %364 = vmatpush3.bf16.msra.mxu0 %v411_v2  ;;  %384 = vmatpush3.bf16.msra.mxu1 %v420_v6  ;;  %v324_v18 = vld [vmem:[%s552_s2] ss:$0 sm:$0xff]  ;;  %s467_s2 = scalar_lea.vmem %s312_s9, 256 }
  0x24   :  { %365 = vmatprep.subr.bf16.mxu0 %v497_v0  ;;  %385 = vmatprep.subr.bf16.mxu1 %v497_v0  ;;  %v342_v28 = vld [vmem:[%s554_s4] ss:$0 sm:$0xff]  ;;  %p468_p10 = scmp.ne.s32.totalorder %s312_s9, %s467_s2  ;;  %p473_p12 = scmp.lt.s32.totalorder %s467_s2, %s467_s2 }
  0x26   :  { %p474_p13 = por %p473_p12, %p472_p11 }
  0x27   :  { %366 = vmatpush3.bf16.msra.mxu0 %v412_v3  ;;  %386 = vmatpush3.bf16.msra.mxu1 %v421_v8 }
  0x28   :  { %367 = vmatprep.subr.bf16.mxu0 %v497_v0  ;;  %387 = vmatprep.subr.bf16.mxu1 %v497_v0  ;;  %p475_p0 = pnand %p474_p13, %p468_p10 }
  0x2b   :  { %368 = vmatpush3.bf16.msra.mxu0 %v413_v5  ;;  %388 = vmatpush3.bf16.msra.mxu1 %v422_v10 }
  0x2c   :  { %369 = vmatprep.subr.bf16.mxu0 %v497_v0  ;;  %389 = vmatprep.subr.bf16.mxu1 %v497_v0 }
  0x2f   :  { %370 = vmatpush3.bf16.msra.mxu0 %v414_v7  ;;  %390 = vmatpush3.bf16.msra.mxu1 %v423_v12 }
  0x30   :  { %371 = vmatprep.subr.bf16.mxu0 %v497_v0  ;;  %391 = vmatprep.subr.bf16.mxu1 %v497_v0 }
  0x33   :  { %372 = vmatpush3.bf16.msra.mxu0 %v415_v9  ;;  %392 = vmatpush3.bf16.msra.mxu1 %v424_v15 }
  0x34   :  { %373 = vmatprep.subr.bf16.mxu0 %v497_v0  ;;  %393 = vmatprep.subr.bf16.mxu1 %v497_v0 }
  0x37   :  { %374 = vmatpush3.bf16.msra.mxu0 %v416_v11  ;;  %394 = vmatpush3.bf16.msra.mxu1 %v425_v16 }
  0x38   :  { %375 = vmatprep.subr.bf16.mxu0 %v497_v0  ;;  %395 = vmatprep.subr.bf16.mxu1 %v497_v0 }
  0x3b   :  { %376 = vmatpush3.bf16.msra.mxu0 %v417_v13  ;;  %396 = vmatpush3.bf16.msra.mxu1 %v426_v17 }
  0x3e   :  { %378 = vmatmul.mubr.bf16.vlgmr.msra.gmra.mxu0 %v418_v14 }
  0xfe   :  { %v169_v19 = vpop.f32.mrf.mxu0 }
  0xff   :  { %v170_v21 = vadd.f32 %v324_v18, %v169_v19 }
 0x100   :  { %v379_v20 = vpop.f32.mrf.mxu0 }
 0x101   :  { %v176_v25 = vmax.f32 %v170_v21, 0.0 }
 0x102   :  { %v172_v22 = vpop.f32.mrf.mxu0 }
 0x103   :  { %v173_v23 = vadd.f32 %v324_v18, %v172_v22 }
 0x104   :  { %v380_v24 = vpop.f32.mrf.mxu0 }
 0x105   :  { %v177_v26 = vmax.f32 %v173_v23, 0.0 }
 0x107   :  { %v180_v27 = vpack.c.bf16 %v177_v26, %v176_v25 }
 0x109   :  { %398 = vmatmul.mubr.bf16.vlgmr.msra.gmra.mxu1 %v180_v27 }
 0x1c9   :  { %v279_v29 = vpop.f32.mrf.mxu1 }
 0x1ca   :  { %v302_v30 = vadd.f32 %v342_v28, %v279_v29 }
 0x1cb   :  { %v399_v31 = vpop.f32.mrf.mxu1 }
 0x1cc   :  { %304 = vst [vmem:[#allocation8] sm:$0xff] %v302_v30 }
 0x1cd   :  { %v282_v32 = vpop.f32.mrf.mxu1 }
 0x1ce   :  { %v303_v33 = vadd.f32 %v342_v28, %v282_v32 }
 0x1cf   :  { %v400_v34 = vpop.f32.mrf.mxu1 }
 0x1d0   :  { %305 = vst [vmem:[#allocation8 + $0x8] sm:$0xff] %v303_v33 }
 0x1d1   :  { %478 = shalt.err (!%p475_p0)
}
 0x1d2   :  { %s500_s10 = smov 128   ;;  %s501_s4 = smov 8  }
 0x1d3   :  { %317 = dma.vmem_to_hbm [thread:$0]  %s312_s9, 256, %s555_s5, [#allocation5], %s500_s10, %s500_s10, %s501_s4  }
 0x1d4   :  { %491 = dma.done.wait [#allocation5], 256  }
 0x1d5   :  { %492 = vsyncadd [#allocation5], 4294967040 }
 0x1d6   :  { %321 = vsyncpa [#allocation4], 1 }
 0x1d7   :  { %322 = vsyncpa [#allocation7], 1 }
 0x1d8   :  { %323 = vsyncpa [#allocation5], 1 }

</bundles_post_ra>
